<compile_context>
chip_gen: v6e
topology: v6e:2x2x1
jax: 0.10.0
libtpu: 0.0.40
codegen_flags: <defaults>
</compile_context>

<pallas_src>
import functools

import jax
import jax.numpy as jnp
from jax.experimental import pallas as pl
from jax.experimental.pallas import tpu as pltpu


def _round_up(x, m):
    return (x + m - 1) // m * m


H0 = 128   # fc0 out (100) padded to lane width
H1 = 128   # fc1 out (50)  padded to lane width
OUT = 128  # fc2 out (10)  padded to lane width

FUSED_MAX_ROWS = 1024  # below this, run a single fused (MLP + log_softmax) call
TILE_B = 512           # batch tile for the large-batch path (multiple of 16)


# ----------------------------- kernels ------------------------------------ #

def _mlp_logits_f32(x_ref, w0_ref, w1_ref, w2_ref, b_ref):
    """(BN1-folded fc0)+ReLU -> (BN2-folded fc1)+ReLU -> fc2+ReLU on one tile.
    Dropout layers are identity in eval mode.  b_ref rows = [b0, b1, b2]."""
    h = jnp.dot(x_ref[...], w0_ref[...], preferred_element_type=jnp.float32)
    h = jnp.maximum(h + b_ref[0:1, :], 0.0)
    h = jnp.dot(h.astype(jnp.bfloat16), w1_ref[...],
                preferred_element_type=jnp.float32)
    h = jnp.maximum(h + b_ref[1:2, :], 0.0)
    h = jnp.dot(h.astype(jnp.bfloat16), w2_ref[...],
                preferred_element_type=jnp.float32)
    return jnp.maximum(h + b_ref[2:3, :], 0.0)


def mlp_kernel(x_ref, w0_ref, w1_ref, w2_ref, b_ref, o_ref):
    """One batch tile of the MLP; logits stored in o_ref.dtype (bf16)."""
    o_ref[...] = _mlp_logits_f32(x_ref, w0_ref, w1_ref, w2_ref, b_ref
                                 ).astype(o_ref.dtype)


def mlp_logsoftmax_kernel(x_ref, w0_ref, w1_ref, w2_ref, b_ref, o_ref):
    """Whole forward in one shot (single batch tile), incl. F.log_softmax(x, 0).
    log_softmax over dim 0 is per-column independent, so the padded columns
    just compute a harmless -log(B) that gets sliced off outside."""
    logits = _mlp_logits_f32(x_ref, w0_ref, w1_ref, w2_ref, b_ref)
    mx = jnp.max(logits, axis=0, keepdims=True)
    s = logits - mx
    lse = jnp.log(jnp.sum(jnp.exp(s), axis=0, keepdims=True))
    o_ref[...] = (s - lse).astype(o_ref.dtype)


# ------------------------- parameter preparation --------------------------- #

def make_params(key, image_size):
    """Deterministic parameter init (shapes match the PyTorch __init__)."""
    ks = jax.random.split(key, 12)

    def linear(kw, kb, fan_in, fan_out):
        bound = 1.0 / jnp.sqrt(jnp.float32(fan_in))
        w = jax.random.uniform(kw, (fan_out, fan_in), jnp.float32, -bound, bound)
        b = jax.random.uniform(kb, (fan_out,), jnp.float32, -bound, bound)
        return w, b

    w0, b0 = linear(ks[0], ks[1], image_size, 100)
    w1, b1 = linear(ks[2], ks[3], 100, 50)
    w2, b2 = linear(ks[4], ks[5], 50, 10)

    def bn(kg, kb, km, kv, n):
        gamma = 1.0 + 0.1 * jax.random.normal(kg, (n,), jnp.float32)
        beta = 0.1 * jax.random.normal(kb, (n,), jnp.float32)
        rmean = 0.1 * jax.random.normal(km, (n,), jnp.float32)
        rvar = 0.5 + jnp.abs(jax.random.normal(kv, (n,), jnp.float32))
        return gamma, beta, rmean, rvar

    g1, be1, m1, v1 = bn(ks[6], ks[7], ks[8], ks[9], image_size)
    g2, be2, m2, v2 = bn(ks[10], ks[11], ks[6], ks[7], 100)

    return dict(w0=w0, b0=b0, w1=w1, b1=b1, w2=w2, b2=b2,
                g1=g1, be1=be1, m1=m1, v1=v1,
                g2=g2, be2=be2, m2=m2, v2=v2)


def fold_and_pad_params(params, image_size):
    """Fold eval-mode BatchNorms into the Linears, transpose to (in, out),
    zero-pad all dims to lane-friendly sizes, cast matmul weights to bf16,
    and pack the three biases into one (3, 128) f32 operand.  Done ONCE,
    outside the per-call path."""
    eps = jnp.float32(1e-5)

    # BN1 folded into fc0:  bn1(x) = x*a1 + c1
    a1 = params["g1"] * jax.lax.rsqrt(params["v1"] + eps)         # (D,)
    c1 = params["be1"] - params["m1"] * a1
    w0t = params["w0"].T * a1[:, None]                             # (D, 100)
    b0f = params["b0"] + c1 @ params["w0"].T                       # (100,)

    # BN2 folded into fc1:  bn2(h) = h*a2 + c2
    a2 = params["g2"] * jax.lax.rsqrt(params["v2"] + eps)          # (100,)
    c2 = params["be2"] - params["m2"] * a2
    w1t = params["w1"].T * a2[:, None]                             # (100, 50)
    b1f = params["b1"] + c2 @ params["w1"].T                       # (50,)

    w2t = params["w2"].T                                           # (50, 10)
    b2f = params["b2"]                                             # (10,)

    d_pad = _round_up(image_size, 128)

    def pad_w(w, rows, cols):
        out = jnp.zeros((rows, cols), jnp.float32)
        return out.at[:w.shape[0], :w.shape[1]].set(w).astype(jnp.bfloat16)

    b = jnp.zeros((3, OUT), jnp.float32)
    b = b.at[0, :b0f.shape[0]].set(b0f)
    b = b.at[1, :b1f.shape[0]].set(b1f)
    b = b.at[2, :b2f.shape[0]].set(b2f)

    return dict(
        w0=pad_w(w0t, d_pad, H0),   # BN1 folded
        w1=pad_w(w1t, H0, H1),      # BN2 folded
        w2=pad_w(w2t, H1, OUT),
        b=b,                        # packed [b0; b1; b2]
    )


# ------------------------------- forward ----------------------------------- #

@functools.partial(jax.jit, static_argnames=("image_size",))
def thirdnet_forward(x, prep, image_size):
    # bf16 first, then pad only the feature dim (no f32 staging copy,
    # no dead padded batch rows).
    xf = x.reshape(-1, image_size).astype(jnp.bfloat16)
    B = xf.shape[0]
    d_pad = prep["w0"].shape[0]
    if d_pad != image_size:
        xf = jnp.pad(xf, ((0, 0), (0, d_pad - image_size)))

    w_bytes = sum(int(prep[k].size) * prep[k].dtype.itemsize
                  for k in ("w0", "w1", "w2", "b"))
    mm_flops = 2 * B * (d_pad * H0 + H0 * H1 + H1 * OUT)
    vmem = pl.BlockSpec(memory_space=pltpu.MemorySpace.VMEM)

    if B <= FUSED_MAX_ROWS:
        # Single fused invocation: the whole (B, d_pad) bf16 tile plus weights
        # sit in VMEM (< 3 MiB even at B=1024, image_size=784), and the
        # batch-coupled dim-0 log_softmax happens in-kernel.  One launch, one
        # HBM write of the final result.
        cost = pl.CostEstimate(
            flops=mm_flops, transcendentals=B * OUT,
            bytes_accessed=int(xf.size) * 2 + w_bytes + B * OUT * 4)
        out = pl.pallas_call(
            mlp_logsoftmax_kernel,
            out_shape=jax.ShapeDtypeStruct((B, OUT), jnp.float32),
            in_specs=[vmem] * 5,
            out_specs=vmem,
            cost_estimate=cost,
        )(xf, prep["w0"], prep["w1"], prep["w2"], prep["b"])
        return out[:, :10]

    # Large batch: tile over rows ("parallel" -> megacore / both v7x TCs;
    # pl.cdiv lets Pallas clamp the ragged last block).  Logits are emitted in
    # bf16 to halve the dominant byte stream.  The dim-0 log_softmax couples
    # every batch tile, so it runs in plain XLA on the tiny (B, 10) f32 slice
    # (a ~0.5 KB/row op that is already at the HBM roofline there).
    cost = pl.CostEstimate(
        flops=mm_flops, transcendentals=0,
        bytes_accessed=int(xf.size) * 2 + w_bytes + B * OUT * 2)
    logits = pl.pallas_call(
        mlp_kernel,
        out_shape=jax.ShapeDtypeStruct((B, OUT), jnp.bfloat16),
        grid_spec=pltpu.PrefetchScalarGridSpec(
            num_scalar_prefetch=0,
            grid=(pl.cdiv(B, TILE_B),),
            in_specs=[
                pl.BlockSpec((TILE_B, d_pad), lambda i: (i, 0)),  # x: batch-tiled
                pl.BlockSpec((d_pad, H0), lambda i: (0, 0)),      # fc0 (BN1 folded)
                pl.BlockSpec((H0, H1), lambda i: (0, 0)),         # fc1 (BN2 folded)
                pl.BlockSpec((H1, OUT), lambda i: (0, 0)),        # fc2
                pl.BlockSpec((3, OUT), lambda i: (0, 0)),         # packed biases
            ],
            out_specs=pl.BlockSpec((TILE_B, OUT), lambda i: (i, 0)),
        ),
        compiler_params=pltpu.CompilerParams(
            dimension_semantics=("parallel",)),
        cost_estimate=cost,
    )(xf, prep["w0"], prep["w1"], prep["w2"], prep["b"])
    return jax.nn.log_softmax(logits[:, :10].astype(jnp.float32), axis=0)


# ------------------------------ reference ---------------------------------- #

def reference_forward(x, params, image_size):
    eps = 1e-5
    xf = x.reshape(-1, image_size).astype(jnp.float32)
    h = (xf - params["m1"]) / jnp.sqrt(params["v1"] + eps) * params["g1"] + params["be1"]
    h = jnp.maximum(h @ params["w0"].T + params["b0"], 0.0)
    h = (h - params["m2"]) / jnp.sqrt(params["v2"] + eps) * params["g2"] + params["be2"]
    h = jnp.maximum(h @ params["w1"].T + params["b1"], 0.0)
    h = jnp.maximum(h @ params["w2"].T + params["b2"], 0.0)
    return jax.nn.log_softmax(h, axis=0)


if __name__ == "__main__":
    key = jax.random.PRNGKey(0)
    k_x, k_p, k_x2 = jax.random.split(key, 3)

    # small shapes: x is (B, C, H, W) = (8, 1, 8, 8) -> image_size = 64
    B, C, H, W = 8, 1, 8, 8
    image_size = C * H * W
    x = jax.random.normal(k_x, (B, C, H, W), jnp.float32)
    params = make_params(k_p, image_size)
    prep = fold_and_pad_params(params, image_size)

    # Fused single-tile path (B <= FUSED_MAX_ROWS).
    out = thirdnet_forward(x, prep, image_size)
    jax.block_until_ready(out)
    ref = reference_forward(x, params, image_size)
    assert out.shape == (B, 10)
    err = float(jnp.max(jnp.abs(out - ref)))
    # bf16 matmul operands -> compare against the f32 reference at bf16-level tolerance.
    assert jnp.allclose(out, ref, atol=5e-2, rtol=5e-2), \
        f"fused path mismatch vs reference (max abs err {err})"

    # Batch-tiled path (grid > 1, ragged last block) on a larger batch.
    B2 = 1300
    x2 = jax.random.normal(k_x2, (B2, C, H, W), jnp.float32)
    out2 = thirdnet_forward(x2, prep, image_size)
    jax.block_until_ready(out2)
    ref2 = reference_forward(x2, params, image_size)
    assert out2.shape == (B2, 10)
    err2 = float(jnp.max(jnp.abs(out2 - ref2)))
    assert jnp.allclose(out2, ref2, atol=5e-2, rtol=5e-2), \
        f"tiled path mismatch vs reference (max abs err {err2})"

    print("KERNEL_OK")
</pallas_src>

<mosaic_0001>
module attributes {stable_mosaic.version = 11 : i64} {
  func.func @mlp_logsoftmax_kernel(%arg0: memref<8x128xbf16, #tpu.memory_space<vmem>>, %arg1: memref<128x128xbf16, #tpu.memory_space<vmem>>, %arg2: memref<128x128xbf16, #tpu.memory_space<vmem>>, %arg3: memref<128x128xbf16, #tpu.memory_space<vmem>>, %arg4: memref<3x128xf32, #tpu.memory_space<vmem>>, %arg5: memref<8x128xf32, #tpu.memory_space<vmem>>) attributes {dimension_semantics = [], scalar_prefetch = 0 : i64, scratch_operands = 0 : i64, tpu.core_type = #tpu.core_type<tc>} {
    %c0 = arith.constant 0 : index
    %c0_0 = arith.constant 0 : index
    %0 = vector.load %arg0[%c0, %c0_0] : memref<8x128xbf16, #tpu.memory_space<vmem>>, vector<8x128xbf16>
    %c0_1 = arith.constant 0 : index
    %c0_2 = arith.constant 0 : index
    %1 = vector.load %arg1[%c0_1, %c0_2] : memref<128x128xbf16, #tpu.memory_space<vmem>>, vector<128x128xbf16>
    %cst = arith.constant dense<0.000000e+00> : vector<8x128xf32>
    %2 = tpu.matmul %0, %1, %cst {dimension_numbers = #tpu.dot_dimension_numbers<[1], [0], [0], [1], [0, 0, 1, 1], [], []>} : vector<8x128xbf16>, vector<128x128xbf16>, vector<8x128xf32> -> vector<8x128xf32>
    %c0_3 = arith.constant 0 : index
    %c0_4 = arith.constant 0 : index
    %3 = vector.load %arg4[%c0_3, %c0_4] : memref<3x128xf32, #tpu.memory_space<vmem>>, vector<1x128xf32>
    %4 = vector.broadcast %3 : vector<1x128xf32> to vector<8x128xf32>
    %5 = arith.addf %2, %4 : vector<8x128xf32>
    %cst_5 = arith.constant 0.000000e+00 : f32
    %6 = vector.broadcast %cst_5 : f32 to vector<8x128xf32>
    %7 = arith.maximumf %5, %6 : vector<8x128xf32>
    %8 = arith.truncf %7 : vector<8x128xf32> to vector<8x128xbf16>
    %c0_6 = arith.constant 0 : index
    %c0_7 = arith.constant 0 : index
    %9 = vector.load %arg2[%c0_6, %c0_7] : memref<128x128xbf16, #tpu.memory_space<vmem>>, vector<128x128xbf16>
    %cst_8 = arith.constant dense<0.000000e+00> : vector<8x128xf32>
    %10 = tpu.matmul %8, %9, %cst_8 {dimension_numbers = #tpu.dot_dimension_numbers<[1], [0], [0], [1], [0, 0, 1, 1], [], []>} : vector<8x128xbf16>, vector<128x128xbf16>, vector<8x128xf32> -> vector<8x128xf32>
    %c1 = arith.constant 1 : index
    %c0_9 = arith.constant 0 : index
    %11 = vector.load %arg4[%c1, %c0_9] : memref<3x128xf32, #tpu.memory_space<vmem>>, vector<1x128xf32>
    %12 = vector.broadcast %11 : vector<1x128xf32> to vector<8x128xf32>
    %13 = arith.addf %10, %12 : vector<8x128xf32>
    %cst_10 = arith.constant 0.000000e+00 : f32
    %14 = vector.broadcast %cst_10 : f32 to vector<8x128xf32>
    %15 = arith.maximumf %13, %14 : vector<8x128xf32>
    %16 = arith.truncf %15 : vector<8x128xf32> to vector<8x128xbf16>
    %c0_11 = arith.constant 0 : index
    %c0_12 = arith.constant 0 : index
    %17 = vector.load %arg3[%c0_11, %c0_12] : memref<128x128xbf16, #tpu.memory_space<vmem>>, vector<128x128xbf16>
    %cst_13 = arith.constant dense<0.000000e+00> : vector<8x128xf32>
    %18 = tpu.matmul %16, %17, %cst_13 {dimension_numbers = #tpu.dot_dimension_numbers<[1], [0], [0], [1], [0, 0, 1, 1], [], []>} : vector<8x128xbf16>, vector<128x128xbf16>, vector<8x128xf32> -> vector<8x128xf32>
    %c2 = arith.constant 2 : index
    %c0_14 = arith.constant 0 : index
    %19 = vector.load %arg4[%c2, %c0_14] : memref<3x128xf32, #tpu.memory_space<vmem>>, vector<1x128xf32>
    %20 = vector.broadcast %19 : vector<1x128xf32> to vector<8x128xf32>
    %21 = arith.addf %18, %20 : vector<8x128xf32>
    %cst_15 = arith.constant 0.000000e+00 : f32
    %22 = vector.broadcast %cst_15 : f32 to vector<8x128xf32>
    %23 = arith.maximumf %21, %22 : vector<8x128xf32>
    %cst_16 = arith.constant dense<0xFF800000> : vector<128xf32>
    %24 = vector.multi_reduction <maximumf>, %23, %cst_16 [0] : vector<8x128xf32> to vector<128xf32>
    %25 = vector.shape_cast %24 : vector<128xf32> to vector<1x128xf32>
    %26 = vector.broadcast %25 : vector<1x128xf32> to vector<8x128xf32>
    %27 = arith.subf %23, %26 : vector<8x128xf32>
    %28 = math.exp %27 : vector<8x128xf32>
    %cst_17 = arith.constant dense<0.000000e+00> : vector<128xf32>
    %29 = vector.multi_reduction <add>, %28, %cst_17 [0] : vector<8x128xf32> to vector<128xf32>
    %30 = vector.shape_cast %29 : vector<128xf32> to vector<1x128xf32>
    %31 = math.log %30 : vector<1x128xf32>
    %32 = vector.broadcast %31 : vector<1x128xf32> to vector<8x128xf32>
    %33 = arith.subf %27, %32 : vector<8x128xf32>
    %c0_18 = arith.constant 0 : index
    %c0_19 = arith.constant 0 : index
    %34 = vector.load %arg5[%c0_18, %c0_19] : memref<8x128xf32, #tpu.memory_space<vmem>>, vector<8x128xf32>
    tpu.vector_store %arg5[%c0_18, %c0_19], %33 {strides = array<i32>} : memref<8x128xf32, #tpu.memory_space<vmem>>, vector<8x128xf32>,
    return
  }
}

</mosaic_0001>

<bundles_post_ra>
// kernel: thirdnet_forward.1
= control target key start
LH: loop header
LB: loop body
LE: loop exit
PB: predicated region body
PF: predicated region fallthrough
CT: control target
= control target key end

     0   :  { %10 = vsyncpa [#allocation3], 0  ;;  %s727_s0 = inlined_call_operand.vmem [shape: bf16[8,128], index: 0, kind: input, shape index: {}]   ;;  %s728_s1 = inlined_call_operand.vmem [shape: bf16[128,128], index: 1, kind: input, shape index: {}]   ;;  %s729_s2 = inlined_call_operand.vmem [shape: bf16[128,128], index: 2, kind: input, shape index: {}]   ;;  %s730_s3 = inlined_call_operand.hbm [shape: bf16[128,128], index: 3, kind: input, shape index: {}]   ;;  %s731_s4 = inlined_call_operand.vmem [shape: f32[3,128], index: 4, kind: input, shape index: {}]   ;;  %s732_s5 = inlined_call_operand.hbm [shape: f32[8,128], index: 5, kind: output, shape index: {}]  }
   0x1   :  { %11 = vsyncpa [#allocation4], 0  ;;  %s595_s18 = smov [#allocation2]  }
   0x2   :  { %s23_s19 = sshll.u32 %s595_s18, 4  ;;  %s24_s19 = int_to_ptr.vmem [resolvable:$true] %s23_s19 }
   0x3   :  { %s559_s20 = scalar_lea.vmem %s24_s19, 1024  ;;  %p564_p1 = scmp.lt.s32.totalorder %s24_s19, %s24_s19 }
   0x4   :  { %p560_p0 = scmp.ne.s32.totalorder %s24_s19, %s559_s20  ;;  %p565_p2 = scmp.lt.s32.totalorder %s559_s20, %s559_s20 }
   0x6   :  { %p566_p3 = por %p565_p2, %p564_p1 }
   0x8   :  { %p567_p4 = pnand %p566_p3, %p560_p0 }
   0xa   :  { %570 = shalt.err (!%p567_p4)
}
   0xb   :  { %s596_s21 = smov 64   ;;  %s597_s22 = smov 4  }
   0xc   :  { %29 = dma.hbm_to_vmem [thread:$0]  %s730_s3, 1024, %s24_s19, [#allocation3], %s596_s21, %s596_s21, %s597_s22  }
   0xd   :  { %591 = dma.done.wait [#allocation3], 1024  }
   0xe   :  { %592 = vsyncadd [#allocation3], 4294966272  ;;  %v598_v0 = vmov 0.0   ;;  %vm599_vm0 = vmmov 0   ;;  %v523_v1 = vld [vmem:[%s728_s1 + $0x38] sm:$0xff]   ;;  %v524_v2 = vld [vmem:[%s728_s1 + $0x30] sm:$0xff]  }
   0xf   :  { %457 = vmatprep.subr.bf16.mxu0 %v598_v0  ;;  %473 = vmatprep.mubr.msk.bf16.mxu0 %vm599_vm0, %v598_v0  ;;  %v525_v3 = vld [vmem:[%s728_s1 + $0x28] sm:$0xff]   ;;  %v531_v4 = vld [vmem:[%s729_s2 + $0x38] sm:$0xff]   ;;  %v526_v5 = vld [vmem:[%s728_s1 + $0x20] sm:$0xff]  }
  0x10   :  { %477 = vmatprep.subr.bf16.mxu1 %v598_v0  ;;  %493 = vmatprep.mubr.msk.bf16.mxu1 %vm599_vm0, %v598_v0  ;;  %v532_v6 = vld [vmem:[%s729_s2 + $0x30] sm:$0xff]   ;;  %v527_v7 = vld [vmem:[%s728_s1 + $0x18] sm:$0xff]   ;;  %v533_v8 = vld [vmem:[%s729_s2 + $0x28] sm:$0xff]  }
  0x11   :  { %458 = vmatpush3.bf16.msra.mxu0 %v523_v1  ;;  %478 = vmatpush3.bf16.msra.mxu1 %v531_v4  ;;  %v528_v9 = vld [vmem:[%s728_s1 + $0x10] sm:$0xff]   ;;  %v534_v10 = vld [vmem:[%s729_s2 + $0x20] sm:$0xff]   ;;  %v529_v11 = vld [vmem:[%s728_s1 + $0x8] sm:$0xff]  }
  0x12   :  { %459 = vmatprep.subr.bf16.mxu0 %v598_v0  ;;  %479 = vmatprep.subr.bf16.mxu1 %v598_v0  ;;  %v535_v12 = vld [vmem:[%s729_s2 + $0x18] sm:$0xff]   ;;  %v530_v13 = vld [vmem:[%s728_s1] sm:$0xff]   ;;  %v536_v14 = vld [vmem:[%s729_s2 + $0x10] sm:$0xff]  }
  0x13   :  { %v36_v15 = vld [vmem:[%s727_s0] sm:$0xf]  ;;  %v537_v16 = vld [vmem:[%s729_s2 + $0x8] sm:$0xff]   ;;  %v539_v18 = vld [vmem:[#allocation2 + $0x38] sm:$0xff]  }
  0x14   :  { %v538_v17 = vld [vmem:[%s729_s2] sm:$0xff]   ;;  %v540_v19 = vld [vmem:[#allocation2 + $0x30] sm:$0xff]   ;;  %v541_v20 = vld [vmem:[#allocation2 + $0x28] sm:$0xff]  }
  0x15   :  { %460 = vmatpush3.bf16.msra.mxu0 %v524_v2  ;;  %480 = vmatpush3.bf16.msra.mxu1 %v532_v6  ;;  %v542_v21 = vld [vmem:[#allocation2 + $0x20] sm:$0xff]   ;;  %v543_v22 = vld [vmem:[#allocation2 + $0x18] sm:$0xff]   ;;  %v544_v23 = vld [vmem:[#allocation2 + $0x10] sm:$0xff]  }
  0x16   :  { %461 = vmatprep.subr.bf16.mxu0 %v598_v0  ;;  %481 = vmatprep.subr.bf16.mxu1 %v598_v0  ;;  %v403_v24 = vld [vmem:[%s731_s4] ss:$0 sm:$0xff]  ;;  %v545_v32 = vld [vmem:[#allocation2 + $0x8] sm:$0xff]   ;;  %v412_v34 = vld [vmem:[%s731_s4 + $0x1] ss:$0 sm:$0xff] }
  0x17   :  { %v546_v33 = vld [vmem:[#allocation2] sm:$0xff]  }
  0x18   :  { %v421_v42 = vld [vmem:[%s731_s4 + $0x2] ss:$0 sm:$0xff]  ;;  %s600_s4 = smov [#allocation5]  }
  0x19   :  { %462 = vmatpush3.bf16.msra.mxu0 %v525_v3  ;;  %482 = vmatpush3.bf16.msra.mxu1 %v533_v8  ;;  %s394_s10 = sshll.u32 %s600_s4, 4  ;;  %s395_s10 = int_to_ptr.vmem [resolvable:$true] %s394_s10 }
  0x1a   :  { %463 = vmatprep.subr.bf16.mxu0 %v598_v0  ;;  %483 = vmatprep.subr.bf16.mxu1 %v598_v0  ;;  %s571_s11 = scalar_lea.vmem %s395_s10, 128  ;;  %p576_p6 = scmp.lt.s32.totalorder %s395_s10, %s395_s10 }
  0x1b   :  { %p572_p5 = scmp.ne.s32.totalorder %s395_s10, %s571_s11  ;;  %p577_p7 = scmp.lt.s32.totalorder %s571_s11, %s571_s11 }
  0x1d   :  { %464 = vmatpush3.bf16.msra.mxu0 %v526_v5  ;;  %484 = vmatpush3.bf16.msra.mxu1 %v534_v10  ;;  %p578_p8 = por %p577_p7, %p576_p6 }
  0x1e   :  { %465 = vmatprep.subr.bf16.mxu0 %v598_v0  ;;  %485 = vmatprep.subr.bf16.mxu1 %v598_v0 }
  0x1f   :  { %p579_p9 = pnand %p578_p8, %p572_p5 }
  0x21   :  { %466 = vmatpush3.bf16.msra.mxu0 %v527_v7  ;;  %486 = vmatpush3.bf16.msra.mxu1 %v535_v12 }
  0x22   :  { %467 = vmatprep.subr.bf16.mxu0 %v598_v0  ;;  %487 = vmatprep.subr.bf16.mxu1 %v598_v0 }
  0x25   :  { %468 = vmatpush3.bf16.msra.mxu0 %v528_v9  ;;  %488 = vmatpush3.bf16.msra.mxu1 %v536_v14 }
  0x26   :  { %469 = vmatprep.subr.bf16.mxu0 %v598_v0  ;;  %489 = vmatprep.subr.bf16.mxu1 %v598_v0 }
  0x29   :  { %470 = vmatpush3.bf16.msra.mxu0 %v529_v11  ;;  %490 = vmatpush3.bf16.msra.mxu1 %v537_v16 }
  0x2a   :  { %471 = vmatprep.subr.bf16.mxu0 %v598_v0  ;;  %491 = vmatprep.subr.bf16.mxu1 %v598_v0 }
  0x2d   :  { %472 = vmatpush3.bf16.msra.mxu0 %v530_v13  ;;  %492 = vmatpush3.bf16.msra.mxu1 %v538_v17 }
  0x2e   :  { %497 = vmatprep.subr.bf16.mxu0 %v598_v0 }
  0x30   :  { %474 = vmatmul.mubr.bf16.vlgmr.msra.gmra.mxu0 %v36_v15 }
  0x31   :  { %513 = vmatprep.mubr.msk.bf16.mxu0 %vm599_vm0, %v598_v0  ;;  %498 = vmatpush3.bf16.msra.mxu0 %v539_v18 }
  0x32   :  { %499 = vmatprep.subr.bf16.mxu0 %v598_v0 }
  0x35   :  { %500 = vmatpush3.bf16.msra.mxu0 %v540_v19 }
  0x36   :  { %501 = vmatprep.subr.bf16.mxu0 %v598_v0 }
  0x39   :  { %502 = vmatpush3.bf16.msra.mxu0 %v541_v20 }
  0x3a   :  { %503 = vmatprep.subr.bf16.mxu0 %v598_v0 }
  0x3d   :  { %504 = vmatpush3.bf16.msra.mxu0 %v542_v21 }
  0x3e   :  { %505 = vmatprep.subr.bf16.mxu0 %v598_v0 }
  0x41   :  { %506 = vmatpush3.bf16.msra.mxu0 %v543_v22 }
  0x42   :  { %507 = vmatprep.subr.bf16.mxu0 %v598_v0 }
  0x45   :  { %508 = vmatpush3.bf16.msra.mxu0 %v544_v23 }
  0x46   :  { %509 = vmatprep.subr.bf16.mxu0 %v598_v0 }
  0x49   :  { %510 = vmatpush3.bf16.msra.mxu0 %v545_v32 }
  0x4a   :  { %511 = vmatprep.subr.bf16.mxu0 %v598_v0 }
  0x4d   :  { %512 = vmatpush3.bf16.msra.mxu0 %v546_v33 }
  0xf0   :  { %v140_v25 = vpop.f32.mrf.mxu0 }
  0xf1   :  { %v141_v26 = vadd.f32 %v403_v24, %v140_v25 }
  0xf2   :  { %v475_v27 = vpop.f32.mrf.mxu0 }
  0xf3   :  { %v146_v28 = vmax.f32 %v141_v26, 0.0 }
  0xf4   :  { %v143_v29 = vpop.f32.mrf.mxu0 }
  0xf5   :  { %v147_v30 = vpack.c.bf16 %v146_v28, %v146_v28 }
  0xf6   :  { %v476_v31 = vpop.f32.mrf.mxu0 }
  0xf7   :  { %494 = vmatmul.mubr.bf16.vlgmr.msra.gmra.mxu1 %v147_v30 }
 0x1b7   :  { %v251_v35 = vpop.f32.mrf.mxu1 }
 0x1b8   :  { %v252_v36 = vadd.f32 %v412_v34, %v251_v35 }
 0x1b9   :  { %v495_v37 = vpop.f32.mrf.mxu1 }
 0x1ba   :  { %v257_v38 = vmax.f32 %v252_v36, 0.0 }
 0x1bb   :  { %v254_v39 = vpop.f32.mrf.mxu1 }
 0x1bc   :  { %v258_v40 = vpack.c.bf16 %v257_v38, %v257_v38 }
 0x1bd   :  { %v496_v41 = vpop.f32.mrf.mxu1 }
 0x1be   :  { %514 = vmatmul.mubr.bf16.vlgmr.msra.gmra.mxu0 %v258_v40 }
 0x27e   :  { %v362_v43 = vpop.f32.mrf.mxu0 }
 0x27f   :  { %v363_v44 = vadd.f32 %v421_v42, %v362_v43 }
 0x280   :  { %v515_v45 = vpop.f32.mrf.mxu0 }
 0x281   :  { %v368_v46 = vmax.f32 %v363_v44, 0.0 }
 0x282   :  { %v365_v47 = vpop.f32.mrf.mxu0 }
 0x283   :  { %v369_v48 = vrot.slane %v368_v46, 4 }
 0x284   :  { %v516_v49 = vpop.f32.mrf.mxu0 }
 0x285   :  { %v370_v50 = vmax.f32 %v368_v46, %v369_v48 }
 0x287   :  { %v371_v51 = vrot.slane %v370_v50, 2 }
 0x289   :  { %v372_v52 = vmax.f32 %v370_v50, %v371_v51 }
 0x28b   :  { %v373_v53 = vrot.slane %v372_v52, 1 }
 0x28d   :  { %v374_v54 = vmax.f32 %v372_v52, %v373_v53 }
 0x28f   :  { %v375_v55 = vsub.f32 %v368_v46, %v374_v54 }
 0x291   :  { %v376_v56 = vmul.f32 1.442695, %v375_v55 }
 0x293   :  { %547 = vpow2.f32 %v376_v56 }
 0x2a0   :  { %v548_v57 = vpop.eup %547 }
 0x2a1   :  { %v378_v58 = vrot.slane %v548_v57, 4 }
 0x2a3   :  { %v379_v59 = vadd.f32 %v548_v57, %v378_v58 }
 0x2a5   :  { %v380_v60 = vrot.slane %v379_v59, 2 }
 0x2a7   :  { %v381_v61 = vadd.f32 %v380_v60, %v379_v59 }
 0x2a9   :  { %v382_v62 = vrot.slane %v381_v61, 1 }
 0x2ab   :  { %v383_v63 = vadd.f32 %v382_v62, %v381_v61 }
 0x2ad   :  { %549 = vlog2.f32 %v383_v63 }
 0x2ba   :  { %v550_v0 = vpop.eup %549 }
 0x2bb   :  { %v385_v1 = vmul.f32 0.6931472, %v550_v0 }
 0x2bd   :  { %v386_v2 = vsub.f32 %v375_v55, %v385_v1 }
 0x2bf   :  { %387 = vst [vmem:[#allocation5] sm:$0xff] %v386_v2 }
 0x2c0   :  { %582 = shalt.err (!%p579_p9)
}
 0x2c1   :  { %397 = dma.vmem_to_hbm [thread:$0]  %s395_s10, 128, %s732_s5, [#allocation4]  }
 0x2c2   :  { %593 = dma.done.wait [#allocation4], 128  }
 0x2c3   :  { %594 = vsyncadd [#allocation4], 4294967168 }
 0x2c4   :  { %401 = vsyncpa [#allocation3], 1 }
 0x2c5   :  { %402 = vsyncpa [#allocation4], 1 }

</bundles_post_ra>
